<compile_context>
chip_gen: v5e
topology: v5e:2x2
jax: 0.10.0
libtpu: 0.0.40
codegen_flags: <defaults>
</compile_context>

<pallas_src>
import jax
import jax.numpy as jnp
from jax.experimental import pallas as pl
from jax.experimental.pallas import tpu as pltpu


def _round_up(x, m):
    return (x + m - 1) // m * m


# ----------------------------- Pallas kernel ------------------------------- #
def mlp_kernel(x_ref, w1_ref, b1_ref, w2_ref, b2_ref, o_ref):
    # hidden = tanh(x @ W1 + b1): bf16 operands -> MXU with f32 accumulation;
    # bias add + tanh in f32 (tanh runs on the EUP slot, hidden under DMA).
    h = jnp.tanh(
        jnp.dot(x_ref[...], w1_ref[...], preferred_element_type=jnp.float32)
        + b1_ref[...]
    )
    # logits = hidden @ W2 + b2 (bf16 x bf16 -> f32 acc), stored as bf16.
    o_ref[...] = (
        jnp.dot(h.astype(jnp.bfloat16), w2_ref[...],
                preferred_element_type=jnp.float32)
        + b2_ref[...]
    ).astype(o_ref.dtype)


def _choose_tile_m(n_rows, tile_m_max):
    """Row tile: multiple of 16 (bf16 sublane packing); at most half the
    (16-rounded) row count so the grid has >= 2 steps when possible (v7x dual
    TensorCores), which also bounds padding to < one sub-tile of garbage."""
    n16 = _round_up(n_rows, 16)
    half = _round_up((n16 + 1) // 2, 16)
    return max(16, min(tile_m_max, half))


def mlp_pallas(x2d, w1, b1, w2, b2, *, tile_m_max=2048):
    """x2d: (N, Din) activations -> logits (N, V) bfloat16."""
    N, Din = x2d.shape
    H, V = w2.shape

    # Lane dims padded to 128 with zero columns/rows: padded hidden columns see
    # zero weights + zero bias -> tanh(0)=0; padded W2 rows/cols are zero, so
    # padded logits columns equal the zero bias padding and are sliced off.
    H_pad = _round_up(H, 128)
    V_pad = _round_up(V, 128)
    tile_m = _choose_tile_m(N, tile_m_max)
    N_pad = _round_up(N, tile_m)

    x_p = jnp.pad(x2d.astype(jnp.bfloat16), ((0, N_pad - N), (0, 0)))
    w1_p = jnp.pad(w1.astype(jnp.bfloat16), ((0, 0), (0, H_pad - H)))
    b1_p = jnp.pad(b1.reshape(1, -1).astype(jnp.float32), ((0, 0), (0, H_pad - H)))
    w2_p = jnp.pad(w2.astype(jnp.bfloat16), ((0, H_pad - H), (0, V_pad - V)))
    b2_p = jnp.pad(b2.reshape(1, -1).astype(jnp.float32), ((0, 0), (0, V_pad - V)))

    # Advisory cost for XLA scheduling (lets it overlap the wrapper-side
    # embedding gather/concat with the kernel's HBM traffic).
    flops = 2 * N_pad * (Din * H_pad + H_pad * V_pad)
    bytes_accessed = (
        N_pad * Din * 2            # x (bf16)
        + N_pad * V_pad * 2        # logits (bf16)
        + (Din * H_pad + H_pad * V_pad) * 2   # weights (bf16)
        + (H_pad + V_pad) * 4      # biases (f32)
    )
    cost = pl.CostEstimate(flops=flops,
                           transcendentals=N_pad * H_pad,
                           bytes_accessed=bytes_accessed)

    out = pl.pallas_call(
        mlp_kernel,
        out_shape=jax.ShapeDtypeStruct((N_pad, V_pad), jnp.bfloat16),
        grid_spec=pl.GridSpec(
            grid=(N_pad // tile_m,),
            in_specs=[
                pl.BlockSpec((tile_m, Din), lambda i: (i, 0)),   # x tile (pipelined)
                pl.BlockSpec((Din, H_pad), lambda i: (0, 0)),    # W1 resident
                pl.BlockSpec((1, H_pad), lambda i: (0, 0)),      # b1 resident
                pl.BlockSpec((H_pad, V_pad), lambda i: (0, 0)),  # W2 resident
                pl.BlockSpec((1, V_pad), lambda i: (0, 0)),      # b2 resident
            ],
            out_specs=pl.BlockSpec((tile_m, V_pad), lambda i: (i, 0)),
        ),
        compiler_params=pltpu.CompilerParams(
            dimension_semantics=("parallel",),       # pure row parallelism
            vmem_limit_bytes=32 * 1024 * 1024,       # safe on v5e/v6e/v7x
        ),
        cost_estimate=cost,
    )(x_p, w1_p, b1_p, w2_p, b2_p)
    return out[:N, :V]


# ----------------------------- Module wrapper ------------------------------ #
def mlp_forward(idx, params, *, block_size, vocab_size):
    """Reproduces MLP.forward(idx, targets=None) -> (logits, None)."""
    wte, w1, b1, w2, b2 = (
        params["wte"], params["w1"], params["b1"], params["w2"], params["b2"]
    )
    B, T = idx.shape

    # Context build exactly like the torch loop: gather, roll right along time,
    # stamp the <BLANK>=vocab_size id.  Done in bf16 end-to-end so no f32
    # activation slab is ever materialized in HBM.
    # TODO(synk): fusing this gather into the kernel deferred (see header note).
    wte_bf16 = wte.astype(jnp.bfloat16)
    embs = []
    cur = idx
    for _ in range(block_size):
        embs.append(jnp.take(wte_bf16, cur, axis=0))   # (B, T, n_embd) bf16
        cur = jnp.roll(cur, 1, axis=1)
        cur = cur.at[:, 0].set(vocab_size)
    x = jnp.concatenate(embs, axis=-1)                 # (B, T, block_size*n_embd)

    x2d = x.reshape(B * T, -1)                         # bf16, no f32 copy
    logits2d = mlp_pallas(x2d, w1, b1, w2, b2)         # (B*T, vocab_size) bf16
    logits = logits2d.reshape(B, T, -1).astype(jnp.float32)
    return logits, None                                # targets=None -> loss=None


# --------------------------------- main ------------------------------------ #
if __name__ == "__main__":
    # Small, module-consistent config (makemore char-level defaults, scaled down)
    block_size = 8
    vocab_size = 27
    n_embd = 32
    n_embd2 = 64

    B, T = 2, block_size

    key = jax.random.PRNGKey(0)
    k_wte, k_w1, k_b1, k_w2, k_b2, k_idx = jax.random.split(key, 6)

    params = {
        # nn.Embedding(vocab_size + 1, n_embd)
        "wte": jax.random.normal(k_wte, (vocab_size + 1, n_embd), jnp.float32) * 0.02,
        # nn.Linear(block_size * n_embd, n_embd2)  (stored as (in, out))
        "w1": jax.random.normal(k_w1, (block_size * n_embd, n_embd2), jnp.float32) * 0.05,
        "b1": jax.random.normal(k_b1, (1, n_embd2), jnp.float32) * 0.01,
        # nn.Linear(n_embd2, vocab_size)
        "w2": jax.random.normal(k_w2, (n_embd2, vocab_size), jnp.float32) * 0.05,
        "b2": jax.random.normal(k_b2, (1, vocab_size), jnp.float32) * 0.01,
    }

    idx = jax.random.randint(k_idx, (B, T), 0, vocab_size, dtype=jnp.int32)

    logits, loss = mlp_forward(idx, params, block_size=block_size, vocab_size=vocab_size)
    logits = jax.block_until_ready(logits)

    # Pure-JAX f32 reference for the whole forward (same context build).
    def ref_forward(idx):
        embs = []
        cur = idx
        for _ in range(block_size):
            embs.append(jnp.take(params["wte"], cur, axis=0))
            cur = jnp.roll(cur, 1, axis=1)
            cur = cur.at[:, 0].set(vocab_size)
        x = jnp.concatenate(embs, axis=-1).reshape(B * T, -1)
        h = jnp.tanh(x @ params["w1"] + params["b1"])
        return (h @ params["w2"] + params["b2"]).reshape(B, T, -1)

    ref = ref_forward(idx)
    assert logits.shape == (B, T, vocab_size)
    assert loss is None
    # bf16 activations/operands/output -> bf16-level tolerance vs f32 reference.
    assert jnp.allclose(logits, ref, atol=1e-2, rtol=1e-2)

    # TODO(synk): targets/cross_entropy path not implemented (forward-only kernel).
    print("KERNEL_OK")
</pallas_src>

<mosaic_0001>
module attributes {stable_mosaic.version = 11 : i64} {
  func.func @mlp_kernel(%arg0: i32, %arg1: memref<16x256xbf16, #tpu.memory_space<vmem>>, %arg2: memref<256x128xbf16, #tpu.memory_space<vmem>>, %arg3: memref<1x128xf32, #tpu.memory_space<vmem>>, %arg4: memref<128x128xbf16, #tpu.memory_space<vmem>>, %arg5: memref<1x128xf32, #tpu.memory_space<vmem>>, %arg6: memref<16x128xbf16, #tpu.memory_space<vmem>>) attributes {dimension_semantics = [#tpu.dimension_semantics<parallel>], iteration_bounds = array<i64: 1>, scalar_prefetch = 0 : i64, scratch_operands = 0 : i64, tpu.core_type = #tpu.core_type<tc>, window_params = [{transform_indices = @transform_0, window_bounds = array<i64: 16, 256>}, {pipeline_mode = #tpu.pipeline_mode<synchronous>, transform_indices = @transform_1, window_bounds = array<i64: 256, 128>}, {pipeline_mode = #tpu.pipeline_mode<synchronous>, transform_indices = @transform_2, window_bounds = array<i64: 1, 128>}, {pipeline_mode = #tpu.pipeline_mode<synchronous>, transform_indices = @transform_3, window_bounds = array<i64: 128, 128>}, {pipeline_mode = #tpu.pipeline_mode<synchronous>, transform_indices = @transform_4, window_bounds = array<i64: 1, 128>}, {transform_indices = @transform_5, window_bounds = array<i64: 16, 128>}]} {
    %c0 = arith.constant 0 : index
    %c0_0 = arith.constant 0 : index
    %0 = vector.load %arg1[%c0, %c0_0] : memref<16x256xbf16, #tpu.memory_space<vmem>>, vector<16x256xbf16>
    %c0_1 = arith.constant 0 : index
    %c0_2 = arith.constant 0 : index
    %1 = vector.load %arg2[%c0_1, %c0_2] : memref<256x128xbf16, #tpu.memory_space<vmem>>, vector<256x128xbf16>
    %cst = arith.constant dense<0.000000e+00> : vector<16x128xf32>
    %2 = tpu.matmul %0, %1, %cst {dimension_numbers = #tpu.dot_dimension_numbers<[1], [0], [0], [1], [0, 0, 1, 1], [], []>} : vector<16x256xbf16>, vector<256x128xbf16>, vector<16x128xf32> -> vector<16x128xf32>
    %c0_3 = arith.constant 0 : index
    %c0_4 = arith.constant 0 : index
    %3 = vector.load %arg3[%c0_3, %c0_4] : memref<1x128xf32, #tpu.memory_space<vmem>>, vector<1x128xf32>
    %4 = vector.broadcast %3 : vector<1x128xf32> to vector<16x128xf32>
    %5 = arith.addf %2, %4 : vector<16x128xf32>
    %6 = math.tanh %5 : vector<16x128xf32>
    %7 = arith.truncf %6 : vector<16x128xf32> to vector<16x128xbf16>
    %c0_5 = arith.constant 0 : index
    %c0_6 = arith.constant 0 : index
    %8 = vector.load %arg4[%c0_5, %c0_6] : memref<128x128xbf16, #tpu.memory_space<vmem>>, vector<128x128xbf16>
    %cst_7 = arith.constant dense<0.000000e+00> : vector<16x128xf32>
    %9 = tpu.matmul %7, %8, %cst_7 {dimension_numbers = #tpu.dot_dimension_numbers<[1], [0], [0], [1], [0, 0, 1, 1], [], []>} : vector<16x128xbf16>, vector<128x128xbf16>, vector<16x128xf32> -> vector<16x128xf32>
    %c0_8 = arith.constant 0 : index
    %c0_9 = arith.constant 0 : index
    %10 = vector.load %arg5[%c0_8, %c0_9] : memref<1x128xf32, #tpu.memory_space<vmem>>, vector<1x128xf32>
    %11 = vector.broadcast %10 : vector<1x128xf32> to vector<16x128xf32>
    %12 = arith.addf %9, %11 : vector<16x128xf32>
    %13 = arith.truncf %12 : vector<16x128xf32> to vector<16x128xbf16>
    %c0_10 = arith.constant 0 : index
    %c0_11 = arith.constant 0 : index
    %14 = vector.load %arg6[%c0_10, %c0_11] : memref<16x128xbf16, #tpu.memory_space<vmem>>, vector<16x128xbf16>
    tpu.vector_store %arg6[%c0_10, %c0_11], %13 {strides = array<i32>} : memref<16x128xbf16, #tpu.memory_space<vmem>>, vector<16x128xbf16>,
    return
  }
  func.func @transform_0(%arg0: i32) -> (i32, i32) {
    %c0_i32 = arith.constant 0 : i32
    %c0_i32_0 = arith.constant 0 : i32
    return %arg0, %c0_i32 : i32, i32
  }
  func.func @transform_1(%arg0: i32) -> (i32, i32) {
    %c0_i32 = arith.constant 0 : i32
    %c0_i32_0 = arith.constant 0 : i32
    %c0_i32_1 = arith.constant 0 : i32
    return %c0_i32, %c0_i32_0 : i32, i32
  }
  func.func @transform_2(%arg0: i32) -> (i32, i32) {
    %c0_i32 = arith.constant 0 : i32
    %c0_i32_0 = arith.constant 0 : i32
    %c0_i32_1 = arith.constant 0 : i32
    return %c0_i32, %c0_i32_0 : i32, i32
  }
  func.func @transform_3(%arg0: i32) -> (i32, i32) {
    %c0_i32 = arith.constant 0 : i32
    %c0_i32_0 = arith.constant 0 : i32
    %c0_i32_1 = arith.constant 0 : i32
    return %c0_i32, %c0_i32_0 : i32, i32
  }
  func.func @transform_4(%arg0: i32) -> (i32, i32) {
    %c0_i32 = arith.constant 0 : i32
    %c0_i32_0 = arith.constant 0 : i32
    %c0_i32_1 = arith.constant 0 : i32
    return %c0_i32, %c0_i32_0 : i32, i32
  }
  func.func @transform_5(%arg0: i32) -> (i32, i32) {
    %c0_i32 = arith.constant 0 : i32
    %c0_i32_0 = arith.constant 0 : i32
    return %arg0, %c0_i32 : i32, i32
  }
}

</mosaic_0001>

<bundles_post_ra>
// kernel: tpu_custom_call.1
= control target key start
LH: loop header
LB: loop body
LE: loop exit
PB: predicated region body
PF: predicated region fallthrough
CT: control target
= control target key end

     0   :  { %10 = vsyncpa [#allocation3], 0  ;;  %s665_s0 = inlined_call_operand.hbm [shape: bf16[16,256], index: 0, kind: input, shape index: {}]   ;;  %s666_s1 = inlined_call_operand.hbm [shape: bf16[256,128], index: 1, kind: input, shape index: {}]   ;;  %s667_s2 = inlined_call_operand.vmem [shape: f32[1,128], index: 2, kind: input, shape index: {}]   ;;  %s668_s3 = inlined_call_operand.hbm [shape: bf16[128,128], index: 3, kind: input, shape index: {}]   ;;  %s669_s4 = inlined_call_operand.vmem [shape: f32[1,128], index: 4, kind: input, shape index: {}]   ;;  %s670_s5 = inlined_call_operand.hbm [shape: bf16[16,128], index: 5, kind: output, shape index: {}]  }
   0x1   :  { %11 = vsyncpa [#allocation6], 0  ;;  %s30_s20 = sshll.u32 %s666_s1, 4  ;;  %s31_s20 = int_to_ptr.hbm [resolvable:$true] %s30_s20 }
   0x2   :  { %12 = vsyncpa [#allocation4], 0  ;;  %s600_s21 = smov [#allocation5]   ;;  %s17_s25 = sshll.u32 %s665_s0, 4  ;;  %s18_s25 = int_to_ptr.hbm [resolvable:$true] %s17_s25 }
   0x3   :  { %s32_s22 = sshll.u32 %s600_s21, 4  ;;  %s601_s26 = smov 64   ;;  %s33_s22 = int_to_ptr.vmem [resolvable:$true] %s32_s22 }
   0x4   :  { %s602_s27 = smov 4   ;;  %s603_s28 = smov [#allocation2]  }
   0x5   :  { %38 = dma.hbm_to_vmem [thread:$0]  %s31_s20, 2048, %s33_s22, [#allocation6], %s601_s26, %s601_s26, %s602_s27  }
   0x6   :  { %s19_s29 = sshll.u32 %s603_s28, 4  ;;  %s604_s1 = smov 128   ;;  %s20_s29 = int_to_ptr.vmem [resolvable:$true] %s19_s29 }
   0x7   :  { %s605_s30 = smov 8   ;;  %s45_s8 = sshll.u32 %s668_s3, 4  ;;  %s46_s8 = int_to_ptr.hbm [resolvable:$true] %s45_s8 }
   0x8   :  { %25 = dma.hbm_to_vmem [thread:$0]  %s18_s25, 256, %s20_s29, [#allocation3], %s604_s1, %s604_s1, %s605_s30  }
   0x9   :  { %s606_s9 = smov [#allocation7]  }
   0xa   :  { %s47_s0 = sshll.u32 %s606_s9, 4  ;;  %s48_s0 = int_to_ptr.vmem [resolvable:$true] %s47_s0 }
   0xb   :  { %53 = dma.hbm_to_vmem [thread:$0]  %s46_s8, 1024, %s48_s0, [#allocation6], %s601_s26, %s601_s26, %s602_s27  }
   0xc   :  { %594 = dma.done.wait [#allocation3], 256  }
   0xd   :  { %595 = vsyncadd [#allocation3], 4294967040 }
   0xe   :  { %596 = dma.done.wait [#allocation6], 3072  }
   0xf   :  { %597 = vsyncadd [#allocation6], 4294964224  ;;  %v462_v0 = vld [vmem:[#allocation5 + $0x38] sm:$0xff]  ;;  %v461_v2 = vld [vmem:[#allocation5 + $0x30] sm:$0xff]  ;;  %s335_s16 = sshll.u32 %s670_s5, 4  ;;  %s336_s16 = int_to_ptr.hbm [resolvable:$true] %s335_s16 }
  0x10   :  { %v470_v1 = vld [vmem:[#allocation5 + $0x78] sm:$0xff]  ;;  %212 = vmatpush.bf16.msra.mxu0 %v462_v0  ;;  %v469_v3 = vld [vmem:[#allocation5 + $0x70] sm:$0xff]  ;;  %v460_v4 = vld [vmem:[#allocation5 + $0x28] sm:$0xff] }
  0x11   :  { %226 = vmatpush.bf16.msra.mxu1 %v470_v1  ;;  %v468_v5 = vld [vmem:[#allocation5 + $0x68] sm:$0xff]  ;;  %v478_v6 = vld [vmem:[#allocation7 + $0x38] sm:$0xff]  ;;  %v477_v7 = vld [vmem:[#allocation7 + $0x30] sm:$0xff] }
  0x12   :  { %311 = vmatpush.bf16.msra.mxu2 %v478_v6  ;;  %v459_v8 = vld [vmem:[#allocation5 + $0x20] sm:$0xff]  ;;  %v476_v10 = vld [vmem:[#allocation7 + $0x28] sm:$0xff]  ;;  %v458_v11 = vld [vmem:[#allocation5 + $0x18] sm:$0xff] }
  0x13   :  { %v467_v9 = vld [vmem:[#allocation5 + $0x60] sm:$0xff]  ;;  %v466_v12 = vld [vmem:[#allocation5 + $0x58] sm:$0xff]  ;;  %v457_v13 = vld [vmem:[#allocation5 + $0x10] sm:$0xff] }
  0x14   :  { %213 = vmatpush.bf16.msra.mxu0 %v461_v2  ;;  %v465_v14 = vld [vmem:[#allocation5 + $0x50] sm:$0xff]  ;;  %v456_v15 = vld [vmem:[#allocation5 + $0x8] sm:$0xff]  ;;  %v455_v17 = vld [vmem:[#allocation5] sm:$0xff] }
  0x15   :  { %227 = vmatpush.bf16.msra.mxu1 %v469_v3  ;;  %v464_v16 = vld [vmem:[#allocation5 + $0x48] sm:$0xff]  ;;  %v463_v18 = vld [vmem:[#allocation5 + $0x40] sm:$0xff]  ;;  %v351_v19 = vld [vmem:[#allocation2] sm:$0xf] }
  0x16   :  { %312 = vmatpush.bf16.msra.mxu2 %v477_v7  ;;  %v454_v20 = vld [vmem:[#allocation2 + $0x4] sm:$0xf0]  ;;  %v453_v21 = vld [vmem:[#allocation2 + $0x4] sm:$0xf]  ;;  %v353_v22 = vld [vmem:[#allocation2 + $0x8] sm:$0xf0] }
  0x17   :  { %v352_v23 = vor.u32 %v454_v20, %v351_v19  ;;  %v356_v24 = vor.u32 %v453_v21, %v353_v22  ;;  %v475_v25 = vld [vmem:[#allocation7 + $0x20] sm:$0xff]  ;;  %v474_v26 = vld [vmem:[#allocation7 + $0x18] sm:$0xff]  ;;  %v473_v27 = vld [vmem:[#allocation7 + $0x10] sm:$0xff] }
  0x18   :  { %214 = vmatpush.bf16.msra.mxu0 %v460_v4  ;;  %v472_v28 = vld [vmem:[#allocation7 + $0x8] sm:$0xff]  ;;  %v471_v29 = vld [vmem:[#allocation7] sm:$0xff]  ;;  %v492_v30 = vld [vmem:[%s667_s2] ss:$0 sm:$0xff]  ;;  %s607_s2 = smov [#allocation8]  }
  0x19   :  { %228 = vmatpush.bf16.msra.mxu1 %v468_v5  ;;  %v493_v43 = vld [vmem:[%s669_s4] ss:$0 sm:$0xff]  ;;  %s333_s13 = sshll.u32 %s607_s2, 4  ;;  %s334_s13 = int_to_ptr.vmem [resolvable:$true] %s333_s13 }
  0x1a   :  { %313 = vmatpush.bf16.msra.mxu2 %v476_v10 }
  0x1c   :  { %215 = vmatpush.bf16.msra.mxu0 %v459_v8 }
  0x1d   :  { %229 = vmatpush.bf16.msra.mxu1 %v467_v9 }
  0x1e   :  { %314 = vmatpush.bf16.msra.mxu2 %v475_v25 }
  0x20   :  { %216 = vmatpush.bf16.msra.mxu0 %v458_v11 }
  0x21   :  { %230 = vmatpush.bf16.msra.mxu1 %v466_v12 }
  0x22   :  { %315 = vmatpush.bf16.msra.mxu2 %v474_v26 }
  0x24   :  { %217 = vmatpush.bf16.msra.mxu0 %v457_v13 }
  0x25   :  { %231 = vmatpush.bf16.msra.mxu1 %v465_v14 }
  0x26   :  { %316 = vmatpush.bf16.msra.mxu2 %v473_v27 }
  0x28   :  { %218 = vmatpush.bf16.msra.mxu0 %v456_v15 }
  0x29   :  { %232 = vmatpush.bf16.msra.mxu1 %v464_v16 }
  0x2a   :  { %317 = vmatpush.bf16.msra.mxu2 %v472_v28 }
  0x2c   :  { %219 = vmatpush.bf16.msra.mxu0 %v455_v17 }
  0x2d   :  { %233 = vmatpush.bf16.msra.mxu1 %v463_v18 }
  0x2e   :  { %318 = vmatpush.bf16.msra.mxu2 %v471_v29 }
  0x2f   :  { %220 = vmatmul.bf16.vlgmr.msra.gmra.mxu0 %v352_v23 }
  0x30   :  { %234 = vmatmul.bf16.vlgmr.msra.gmra.mxu1 %v356_v24 }
  0xac   :  { %v221_v31 = vpop.f32.mrf.mxu0 }
  0xad   :  { %v235_v32 = vpop.f32.mrf.mxu1  ;;  %v222_v33 = vadd.f32 %v492_v30, %v221_v31 }
  0xaf   :  { %v236_v34 = vadd.f32 %v235_v32, %v222_v33 }
  0xb1   :  { %494 = vtanh.f32 %v236_v34 }
  0xb4   :  { %v223_v35 = vpop.f32.mrf.mxu0 }
  0xb5   :  { %v224_v36 = vadd.f32 %v492_v30, %v223_v35  ;;  %v237_v37 = vpop.f32.mrf.mxu1 }
  0xb7   :  { %v238_v38 = vadd.f32 %v237_v37, %v224_v36  ;;  %v495_v39 = vpop.eup %494 }
  0xb9   :  { %496 = vtanh.f32 %v238_v38 }
  0xbf   :  { %v497_v40 = vpop.eup %496 }
  0xc0   :  { %v242_v41 = vpack.c.bf16 %v497_v40, %v495_v39 }
  0xc2   :  { %319 = vmatmul.bf16.vlgmr.msra.gmra.mxu2 %v242_v41 }
 0x145   :  { %v320_v42 = vpop.f32.mrf.mxu2 }
 0x146   :  { %v321_v45 = vadd.f32 %v493_v43, %v320_v42 }
 0x14d   :  { %v322_v44 = vpop.f32.mrf.mxu2 }
 0x14e   :  { %v323_v46 = vadd.f32 %v493_v43, %v322_v44 }
 0x150   :  { %v482_v47 = vpack.c.bf16 %v323_v46, %v321_v45 }
 0x152   :  { %483 = vst [vmem:[#allocation8] sm:$0xff] %v482_v47  }
 0x153   :  { %341 = dma.vmem_to_hbm [thread:$0]  %s334_s13, 128, %s336_s16, [#allocation4], %s601_s26, %s601_s26, %s602_s27  }
 0x154   :  { %598 = dma.done.wait [#allocation4], 128  }
 0x155   :  { %599 = vsyncadd [#allocation4], 4294967168 }
 0x156   :  { %346 = vsyncpa [#allocation3], 1 }
 0x157   :  { %347 = vsyncpa [#allocation6], 1 }
 0x158   :  { %348 = vsyncpa [#allocation4], 1 }

</bundles_post_ra>
